<compile_context>
chip_gen: v7x
topology: tpu7x:2x2x1
jax: 0.10.0
libtpu: 0.0.40
codegen_flags: <defaults>
</compile_context>

<pallas_src>
import functools

import jax
import jax.numpy as jnp
from jax.experimental import pallas as pl
from jax.experimental.pallas import tpu as pltpu


# ---------------------------------------------------------------------------
# Fused kernel: conv (im2col matmul) + gLN moments + normalize.
# ---------------------------------------------------------------------------
def _convnorm_fused_kernel(xcol_ref, w_ref, b_ref, g_ref, be_ref, o_ref,
                           sum_sc, ssq_sc, scale_sc, shift_sc,
                           *, n_valid, n_pad_cols, eps, single_tile):
    # One lane-dense MXU matmul over the folded (C_in*K) contraction; f32 acc.
    x = xcol_ref[0]                                          # (CK_pad, T_tile)
    y = jnp.dot(w_ref[...], x, preferred_element_type=jnp.float32)
    y = y + b_ref[...].astype(jnp.float32)                   # (C_out_pad, T_tile)

    def finalize_stats(s, q):
        # Analytic correction: padded time columns of y equal the bias exactly
        # (padded channels have zero bias), so no per-tile masking is needed.
        if n_pad_cols:
            b32 = b_ref[...].astype(jnp.float32)
            s = s - n_pad_cols * jnp.sum(b32, axis=(0, 1), keepdims=True)
            q = q - n_pad_cols * jnp.sum(b32 * b32, axis=(0, 1), keepdims=True)
        inv_n = 1.0 / n_valid
        mu = s * inv_n                                        # (1, 1)
        var = jnp.maximum(q * inv_n - mu * mu, 0.0)           # cancellation guard
        inv = jax.lax.rsqrt(var + eps)                        # (1, 1), EUP
        gamma = g_ref[...].astype(jnp.float32)                # (C_out_pad, 1)
        beta = be_ref[...].astype(jnp.float32)
        scale = gamma * inv
        shift = beta - mu * scale
        return scale, shift

    if single_tile:
        # Whole per-sample output fits one tile: single pass, no recompute.
        s = jnp.sum(y, axis=(0, 1), keepdims=True)
        q = jnp.sum(y * y, axis=(0, 1), keepdims=True)
        scale, shift = finalize_stats(s, q)
        o_ref[0] = (y * scale + shift).astype(o_ref.dtype)
        return

    p = pl.program_id(1)
    t = pl.program_id(2)

    # ---- phase 0: accumulate per-sample moments (f32 running sums) ----------
    @pl.when((p == 0) & (t == 0))
    def _init():
        sum_sc[...] = jnp.zeros_like(sum_sc)
        ssq_sc[...] = jnp.zeros_like(ssq_sc)

    @pl.when(p == 0)
    def _acc():
        sum_sc[...] += jnp.sum(y, axis=(0, 1), keepdims=True)
        ssq_sc[...] += jnp.sum(y * y, axis=(0, 1), keepdims=True)

    # ---- phase 1: finalize stats once, then fused scale/shift per tile ------
    @pl.when((p == 1) & (t == 0))
    def _stats():
        scale, shift = finalize_stats(sum_sc[...], ssq_sc[...])
        scale_sc[...] = scale
        shift_sc[...] = shift

    @pl.when(p == 1)
    def _write():
        o_ref[0] = (y * scale_sc[...] + shift_sc[...]).astype(o_ref.dtype)


# ---------------------------------------------------------------------------
# Wrapper helpers.
# ---------------------------------------------------------------------------
def _round_up(v, m):
    return -(-v // m) * m


def _vmem_capacity_bytes():
    try:
        info = pltpu.get_tpu_info()
        cap = getattr(info, "vmem_capacity_bytes", None)
        if cap:
            return int(cap)
    except Exception:
        pass
    return 64 << 20   # conservative fallback (v7x per-core VMEM)


def _pick_time_tile(t_out, ck_pad, c_out_pad, in_isz, out_isz, max_time_tile):
    """Pick a lane-dense time tile sized to the device's VMEM budget."""
    cap = _vmem_capacity_bytes()
    budget = cap // 2                               # headroom for Mosaic scratch
    # Per-time-column bytes: double-buffered xcol tile + double-buffered output
    # tile + f32 temporaries for y / y*y inside the body.
    per_col = 2 * ck_pad * in_isz + 2 * c_out_pad * out_isz + 3 * c_out_pad * 4
    # Resident bytes: weight (x2 buffers), bias/gamma/beta, scratch, slack.
    fixed = 2 * c_out_pad * ck_pad * in_isz + 8 * c_out_pad * 4 + (1 << 16)
    t_fit = max((budget - fixed) // max(per_col, 1), 128)
    cap_tile = 2048 if max_time_tile is None else max(128, max_time_tile)
    t_tile = max((min(t_fit, cap_tile) // 128) * 128, 128)
    if t_out <= t_tile:
        return t_out, t_out, 1, fixed + per_col * t_out
    nt = -(-t_out // t_tile)
    return t_tile, nt * t_tile, nt, fixed + per_col * t_tile


# ---------------------------------------------------------------------------
# Public entry point.
# ---------------------------------------------------------------------------
def conv_norm(x, weight, bias, gamma, beta, *,
              kernel_size, stride=1, dilation=1, padding=0, eps=1e-8,
              max_time_tile=None):
    """ConvNorm forward.  x: (B, C_in, T)."""
    # TODO(synk): groups > 1 (grouped / depthwise conv) not implemented; groups=1 only.
    # TODO(synk): when B < num TensorCores (v7x), also split the time axis
    #             "parallel" in phase 0 with per-chunk partial moments combined
    #             in phase 1, so both cores are busy for B == 1.
    # TODO(synk): for stride==1 memory-bound configs, consider
    #             CompilerParams(allow_input_fusion=...) or a halo'd x_pad feed
    #             so the K-fold im2col is never materialized in HBM.
    B, C_in, T = x.shape
    C_out = weight.shape[0]
    K = kernel_size
    if bias is None:
        bias = jnp.zeros((C_out,), dtype=x.dtype)

    # ---- wrapper-side layout plumbing (no FLOPs) -----------------------------
    x_pad = jnp.pad(x, ((0, 0), (0, 0), (padding, padding)))
    T_pad = T + 2 * padding
    T_conv = (T_pad - dilation * (K - 1) - 1) // stride + 1
    T_out = T_conv - padding if padding > 0 else T_conv      # causal chop

    # im2col: K stride-decimated shifted views stacked on channels, so the
    # kernel does ONE unit-stride lane-dense matmul per tile (index k*C_in+i).
    cols = []
    for k in range(K):
        start = k * dilation
        stop = start + (T_out - 1) * stride + 1
        cols.append(x_pad[:, :, start:stop:stride])
    xcol = jnp.concatenate(cols, axis=1)                      # (B, C_in*K, T_out)
    CK = C_in * K
    w2 = jnp.transpose(weight, (0, 2, 1)).reshape(C_out, CK)  # matches xcol order

    in_isz = jnp.dtype(x.dtype).itemsize
    out_isz = in_isz
    sub = max(8, 32 // max(in_isz, 1))        # sublane pack multiple (8 f32, 16 bf16)
    CK_pad = _round_up(CK, sub)
    C_out_pad = _round_up(C_out, sub)

    T_tile, T_grid, NT, vmem_est = _pick_time_tile(
        T_out, CK_pad, C_out_pad, in_isz, out_isz, max_time_tile)
    single_tile = NT == 1

    if CK_pad != CK:
        xcol = jnp.pad(xcol, ((0, 0), (0, CK_pad - CK), (0, 0)))
        w2 = jnp.pad(w2, ((0, 0), (0, CK_pad - CK)))
    if T_grid != T_out:
        xcol = jnp.pad(xcol, ((0, 0), (0, 0), (0, T_grid - T_out)))
    if C_out_pad != C_out:
        w2 = jnp.pad(w2, ((0, C_out_pad - C_out), (0, 0)))
        bias = jnp.pad(bias, (0, C_out_pad - C_out))
        gamma = jnp.pad(gamma, (0, C_out_pad - C_out))
        beta = jnp.pad(beta, (0, C_out_pad - C_out))
    bias2 = bias.reshape(C_out_pad, 1)
    gamma2 = gamma.reshape(C_out_pad, 1)
    beta2 = beta.reshape(C_out_pad, 1)

    kernel = functools.partial(
        _convnorm_fused_kernel,
        n_valid=float(C_out * T_out),
        n_pad_cols=float(T_grid - T_out),
        eps=float(eps),
        single_tile=single_tile)

    cap = _vmem_capacity_bytes()
    vmem_limit = int(min(int(cap * 0.85), max(2 * vmem_est, 32 << 20)))

    phases = 1 if single_tile else 2
    cost = pl.CostEstimate(
        flops=int(2 * phases * B * C_out_pad * CK_pad * T_grid),
        transcendentals=int(B),
        bytes_accessed=int(phases * B * CK_pad * T_grid * in_isz
                           + C_out_pad * CK_pad * in_isz
                           + B * C_out_pad * T_grid * out_isz))

    grid = (B, 1, 1) if single_tile else (B, 2, NT)

    out = pl.pallas_call(
        kernel,
        out_shape=jax.ShapeDtypeStruct((B, C_out_pad, T_grid), x.dtype),
        grid_spec=pltpu.PrefetchScalarGridSpec(
            num_scalar_prefetch=0,
            grid=grid,                                     # (batch, phase, time)
            in_specs=[
                pl.BlockSpec((1, CK_pad, T_tile), lambda b, p, t: (b, 0, t)),
                pl.BlockSpec((C_out_pad, CK_pad), lambda b, p, t: (0, 0)),
                pl.BlockSpec((C_out_pad, 1), lambda b, p, t: (0, 0)),
                pl.BlockSpec((C_out_pad, 1), lambda b, p, t: (0, 0)),
                pl.BlockSpec((C_out_pad, 1), lambda b, p, t: (0, 0)),
            ],
            # Phase 0 pins the output block index at (b, 0, 0), so no block is
            # flushed until phase 1 writes the normalized tiles -> the f32
            # conv intermediate never touches HBM.
            out_specs=pl.BlockSpec((1, C_out_pad, T_tile),
                                   lambda b, p, t: (b, 0, p * t)),
            scratch_shapes=[
                pltpu.VMEM((1, 1), jnp.float32),           # running sum
                pltpu.VMEM((1, 1), jnp.float32),           # running sum of squares
                pltpu.VMEM((C_out_pad, 1), jnp.float32),   # gLN scale
                pltpu.VMEM((C_out_pad, 1), jnp.float32),   # gLN shift
            ]),
        compiler_params=pltpu.CompilerParams(
            dimension_semantics=("parallel", "arbitrary", "arbitrary"),
            vmem_limit_bytes=vmem_limit),
        cost_estimate=cost,
    )(xcol, w2, bias2, gamma2, beta2)

    if C_out_pad != C_out or T_grid != T_out:
        out = out[:, :C_out, :T_out]
    return out


# ---------------------------------------------------------------------------
# Pure-JAX reference (mirrors the PyTorch module).
# ---------------------------------------------------------------------------
def conv_norm_ref(x, weight, bias, gamma, beta, *,
                  kernel_size, stride=1, dilation=1, padding=0, eps=1e-8):
    y = jax.lax.conv_general_dilated(
        x, weight,
        window_strides=(stride,),
        padding=[(padding, padding)],
        rhs_dilation=(dilation,),
        dimension_numbers=("NCH", "OIH", "NCH"),
        precision=jax.lax.Precision.HIGHEST)
    y = y + bias.reshape(1, -1, 1)
    if padding > 0:
        y = y[:, :, :-padding]
    mu = jnp.mean(y, axis=(1, 2), keepdims=True)
    var = jnp.mean((y - mu) ** 2, axis=(1, 2), keepdims=True)
    out = (y - mu) / jnp.sqrt(var + eps)
    return out * gamma.reshape(1, -1, 1) + beta.reshape(1, -1, 1)


def _run_case(key, B, C_in, C_out, T, K, stride, dilation, padding,
              max_time_tile=None):
    kx, kw, kb, kg, kbe = jax.random.split(key, 5)
    x = jax.random.normal(kx, (B, C_in, T), dtype=jnp.float32)
    weight = jax.random.normal(kw, (C_out, C_in, K), dtype=jnp.float32) * 0.1
    bias = jax.random.normal(kb, (C_out,), dtype=jnp.float32) * 0.1
    gamma = 1.0 + 0.1 * jax.random.normal(kg, (C_out,), dtype=jnp.float32)
    beta = 0.1 * jax.random.normal(kbe, (C_out,), dtype=jnp.float32)

    out = conv_norm(x, weight, bias, gamma, beta,
                    kernel_size=K, stride=stride, dilation=dilation,
                    padding=padding, max_time_tile=max_time_tile)
    out = jax.block_until_ready(out)
    ref = conv_norm_ref(x, weight, bias, gamma, beta,
                        kernel_size=K, stride=stride,
                        dilation=dilation, padding=padding)
    assert out.shape == ref.shape, (out.shape, ref.shape)
    err = float(jnp.max(jnp.abs(out - ref)))
    assert err < 1e-3, err
    return out


if __name__ == "__main__":
    key = jax.random.PRNGKey(0)
    k1, k2, k3 = jax.random.split(key, 3)

    # Small causal config consistent with the module (padding = (K-1)*dilation).
    _run_case(k1, B=2, C_in=6, C_out=8, T=16, K=3, stride=1, dilation=1, padding=2)
    # Longer sequence with a forced small tile -> exercises the two-phase
    # recompute path, the p*t output pinning and the analytic pad correction.
    _run_case(k2, B=1, C_in=4, C_out=16, T=300, K=3, stride=1, dilation=2,
              padding=4, max_time_tile=128)
    # Strided conv with odd channel counts -> exercises C_out / CK padding.
    _run_case(k3, B=2, C_in=5, C_out=7, T=32, K=3, stride=2, dilation=1, padding=1)

    print("KERNEL_OK")
</pallas_src>

<mosaic_0001>
module attributes {stable_mosaic.version = 11 : i64} {
  func.func @_convnorm_fused_kernel(%arg0: i32, %arg1: i32, %arg2: i32, %arg3: memref<1x24x16xf32, #tpu.memory_space<vmem>>, %arg4: memref<8x24xf32, #tpu.memory_space<vmem>>, %arg5: memref<8x1xf32, #tpu.memory_space<vmem>>, %arg6: memref<8x1xf32, #tpu.memory_space<vmem>>, %arg7: memref<8x1xf32, #tpu.memory_space<vmem>>, %arg8: memref<1x8x16xf32, #tpu.memory_space<vmem>>, %arg9: memref<1x1xf32, #tpu.memory_space<vmem>>, %arg10: memref<1x1xf32, #tpu.memory_space<vmem>>, %arg11: memref<8x1xf32, #tpu.memory_space<vmem>>, %arg12: memref<8x1xf32, #tpu.memory_space<vmem>>) attributes {dimension_semantics = [#tpu.dimension_semantics<parallel>, #tpu.dimension_semantics<arbitrary>, #tpu.dimension_semantics<arbitrary>], iteration_bounds = array<i64: 2, 1, 1>, scalar_prefetch = 0 : i64, scratch_operands = 4 : i64, tpu.core_type = #tpu.core_type<tc>, window_params = [{transform_indices = @transform_0, window_bounds = array<i64: 1, 24, 16>}, {pipeline_mode = #tpu.pipeline_mode<synchronous>, transform_indices = @transform_1, window_bounds = array<i64: 8, 24>}, {pipeline_mode = #tpu.pipeline_mode<synchronous>, transform_indices = @transform_2, window_bounds = array<i64: 8, 1>}, {pipeline_mode = #tpu.pipeline_mode<synchronous>, transform_indices = @transform_3, window_bounds = array<i64: 8, 1>}, {pipeline_mode = #tpu.pipeline_mode<synchronous>, transform_indices = @transform_4, window_bounds = array<i64: 8, 1>}, {transform_indices = @transform_5, window_bounds = array<i64: 1, 8, 16>}]} {
    %c0 = arith.constant 0 : index
    %c0_0 = arith.constant 0 : index
    %c0_1 = arith.constant 0 : index
    %0 = vector.load %arg3[%c0, %c0_0, %c0_1] : memref<1x24x16xf32, #tpu.memory_space<vmem>>, vector<1x24x16xf32>
    %1 = vector.shape_cast %0 : vector<1x24x16xf32> to vector<24x16xf32>
    %c0_2 = arith.constant 0 : index
    %c0_3 = arith.constant 0 : index
    %2 = vector.load %arg4[%c0_2, %c0_3] : memref<8x24xf32, #tpu.memory_space<vmem>>, vector<8x24xf32>
    %cst = arith.constant dense<0.000000e+00> : vector<8x16xf32>
    %3 = tpu.matmul %2, %1, %cst {dimension_numbers = #tpu.dot_dimension_numbers<[1], [0], [0], [1], [0, 0, 1, 1], [], []>} : vector<8x24xf32>, vector<24x16xf32>, vector<8x16xf32> -> vector<8x16xf32>
    %c0_4 = arith.constant 0 : index
    %c0_5 = arith.constant 0 : index
    %4 = vector.load %arg5[%c0_4, %c0_5] : memref<8x1xf32, #tpu.memory_space<vmem>>, vector<8x1xf32>
    %5 = vector.broadcast %4 : vector<8x1xf32> to vector<8x16xf32>
    %6 = arith.addf %3, %5 : vector<8x16xf32>
    %7 = vector.shape_cast %6 : vector<8x16xf32> to vector<1x8x16xf32>
    %cst_6 = arith.constant dense<0.000000e+00> : vector<1xf32>
    %8 = vector.multi_reduction <add>, %7, %cst_6 [1, 2] : vector<1x8x16xf32> to vector<1xf32>
    %9 = vector.shape_cast %8 : vector<1xf32> to vector<1x1x1xf32>
    %10 = vector.extract %9[0, 0, 0] : f32 from vector<1x1x1xf32>
    %11 = vector.broadcast %10 : f32 to vector<1x1xf32>
    %12 = arith.mulf %6, %6 : vector<8x16xf32>
    %13 = vector.shape_cast %12 : vector<8x16xf32> to vector<1x8x16xf32>
    %cst_7 = arith.constant dense<0.000000e+00> : vector<1xf32>
    %14 = vector.multi_reduction <add>, %13, %cst_7 [1, 2] : vector<1x8x16xf32> to vector<1xf32>
    %15 = vector.shape_cast %14 : vector<1xf32> to vector<1x1x1xf32>
    %16 = vector.extract %15[0, 0, 0] : f32 from vector<1x1x1xf32>
    %17 = vector.broadcast %16 : f32 to vector<1x1xf32>
    %cst_8 = arith.constant 7.812500e-03 : f32
    %18 = vector.broadcast %cst_8 : f32 to vector<1x1xf32>
    %19 = arith.mulf %11, %18 : vector<1x1xf32>
    %cst_9 = arith.constant 7.812500e-03 : f32
    %20 = vector.broadcast %cst_9 : f32 to vector<1x1xf32>
    %21 = arith.mulf %17, %20 : vector<1x1xf32>
    %22 = arith.mulf %19, %19 : vector<1x1xf32>
    %23 = arith.subf %21, %22 : vector<1x1xf32>
    %cst_10 = arith.constant 0.000000e+00 : f32
    %24 = vector.broadcast %cst_10 : f32 to vector<1x1xf32>
    %25 = arith.maximumf %23, %24 : vector<1x1xf32>
    %cst_11 = arith.constant 9.99999993E-9 : f32
    %26 = vector.broadcast %cst_11 : f32 to vector<1x1xf32>
    %27 = arith.addf %25, %26 : vector<1x1xf32>
    %28 = math.rsqrt %27 : vector<1x1xf32>
    %c0_12 = arith.constant 0 : index
    %c0_13 = arith.constant 0 : index
    %29 = vector.load %arg6[%c0_12, %c0_13] : memref<8x1xf32, #tpu.memory_space<vmem>>, vector<8x1xf32>
    %c0_14 = arith.constant 0 : index
    %c0_15 = arith.constant 0 : index
    %30 = vector.load %arg7[%c0_14, %c0_15] : memref<8x1xf32, #tpu.memory_space<vmem>>, vector<8x1xf32>
    %31 = vector.broadcast %28 : vector<1x1xf32> to vector<8x1xf32>
    %32 = arith.mulf %29, %31 : vector<8x1xf32>
    %33 = vector.broadcast %19 : vector<1x1xf32> to vector<8x1xf32>
    %34 = arith.mulf %33, %32 : vector<8x1xf32>
    %35 = arith.subf %30, %34 : vector<8x1xf32>
    %36 = vector.broadcast %32 : vector<8x1xf32> to vector<8x16xf32>
    %37 = arith.mulf %6, %36 : vector<8x16xf32>
    %38 = vector.broadcast %35 : vector<8x1xf32> to vector<8x16xf32>
    %39 = arith.addf %37, %38 : vector<8x16xf32>
    %c0_16 = arith.constant 0 : index
    %c0_17 = arith.constant 0 : index
    %c0_18 = arith.constant 0 : index
    %40 = vector.load %arg8[%c0_16, %c0_17, %c0_18] : memref<1x8x16xf32, #tpu.memory_space<vmem>>, vector<1x8x16xf32>
    %41 = vector.shape_cast %40 : vector<1x8x16xf32> to vector<8x16xf32>
    %42 = vector.shape_cast %39 : vector<8x16xf32> to vector<1x8x16xf32>
    tpu.vector_store %arg8[%c0_16, %c0_17, %c0_18], %42 {strides = array<i32>} : memref<1x8x16xf32, #tpu.memory_space<vmem>>, vector<1x8x16xf32>,
    return
  }
  func.func @transform_0(%arg0: i32, %arg1: i32, %arg2: i32) -> (i32, i32, i32) {
    %c0_i32 = arith.constant 0 : i32
    %c0_i32_0 = arith.constant 0 : i32
    return %arg0, %c0_i32, %arg2 : i32, i32, i32
  }
  func.func @transform_1(%arg0: i32, %arg1: i32, %arg2: i32) -> (i32, i32) {
    %c0_i32 = arith.constant 0 : i32
    %c0_i32_0 = arith.constant 0 : i32
    %c0_i32_1 = arith.constant 0 : i32
    return %c0_i32, %c0_i32_0 : i32, i32
  }
  func.func @transform_2(%arg0: i32, %arg1: i32, %arg2: i32) -> (i32, i32) {
    %c0_i32 = arith.constant 0 : i32
    %c0_i32_0 = arith.constant 0 : i32
    %c0_i32_1 = arith.constant 0 : i32
    return %c0_i32, %c0_i32_0 : i32, i32
  }
  func.func @transform_3(%arg0: i32, %arg1: i32, %arg2: i32) -> (i32, i32) {
    %c0_i32 = arith.constant 0 : i32
    %c0_i32_0 = arith.constant 0 : i32
    %c0_i32_1 = arith.constant 0 : i32
    return %c0_i32, %c0_i32_0 : i32, i32
  }
  func.func @transform_4(%arg0: i32, %arg1: i32, %arg2: i32) -> (i32, i32) {
    %c0_i32 = arith.constant 0 : i32
    %c0_i32_0 = arith.constant 0 : i32
    %c0_i32_1 = arith.constant 0 : i32
    return %c0_i32, %c0_i32_0 : i32, i32
  }
  func.func @transform_5(%arg0: i32, %arg1: i32, %arg2: i32) -> (i32, i32, i32) {
    %0 = arith.muli %arg1, %arg2 : i32
    %c0_i32 = arith.constant 0 : i32
    %c0_i32_0 = arith.constant 0 : i32
    return %arg0, %c0_i32, %0 : i32, i32, i32
  }
}

</mosaic_0001>

<bundles_post_ra>
// kernel: tpu_custom_call.1
= control target key start
LH: loop header
LB: loop body
LE: loop exit
PB: predicated region body
PF: predicated region fallthrough
CT: control target
= control target key end

     0   :  { %10 = vsyncpa [#allocation7], 0  ;;  %s822_s0 = inlined_call_operand.vmem [shape: f32[2,24,16], index: 0, kind: input, shape index: {}]   ;;  %s823_s1 = inlined_call_operand.vmem [shape: f32[8,24], index: 1, kind: input, shape index: {}]   ;;  %s824_s2 = inlined_call_operand.vmem [shape: f32[8,1], index: 2, kind: input, shape index: {}]   ;;  %s825_s3 = inlined_call_operand.vmem [shape: f32[8,1], index: 3, kind: input, shape index: {}]   ;;  %s826_s4 = inlined_call_operand.vmem [shape: f32[8,1], index: 4, kind: input, shape index: {}]   ;;  %s827_s5 = inlined_call_operand.hbm [shape: f32[2,8,16], index: 5, kind: output, shape index: {}]  }
   0x1   :  { %12 = vsyncpa [#allocation7 + $0x1], 0  ;;  %s695_s18 = smov 0   ;;  %s697_s19 = smov 0  }
   0x2   :  { %s699_s20 = smov 0   ;;  %s701_s21 = smov 0  }
   0x3   :  { %s703_s22 = smov 0   ;;  %s705_s23 = smov 0  }
   0x4 LB: > { %s484_s24 = sadd.s32 4294967295, %s658_s23   ;;  %s485_s25 = sadd.s32 4294967294, %s658_s23   ;;  %s658_s23 = sphi %s705_s23, %s18_s23   ;;  %s654_s22 = sphi %s703_s22, %s834_s22   ;;  %s650_s21 = sphi %s701_s21, %s833_s21   ;;  %s646_s20 = sphi %s699_s20, %s832_s20   ;;  %s642_s19 = sphi %s697_s19, %s831_s19   ;;  %s638_s18 = sphi %s695_s18, %s830_s18  }
   0x5   : > { %s37_s26 = sadd.s32 1, %s654_s22  ;;  %s160_s27 = sadd.s32 1, %s646_s20 }
   0x6   : > { %p39_p0 = scmp.ge.s32.totalorder %s37_s26, 2  ;;  %p170_p1 = scmp.ne.s32.totalorder %s646_s20, %s642_s19 }
   0x7   : > { %p171_p2 = scmp.eq.s32.totalorder %s484_s24, 1  ;;  %p176_p3 = scmp.ne.s32.totalorder %s642_s19, %s638_s18 }
   0x8   : > { %s836_s26 = smov (%p39_p0, %s37_s26), 0  ;;  %p177_p5 = scmp.eq.s32.totalorder %s485_s25, 1 }
   0x9   : > { %p735_p4 = por %p171_p2, %p170_p1  ;;  %s155_s29 = ssub.s32 %s654_s22, %s836_s26 }
   0xa   : > { %p488_p6 = scmp.ge.s32.totalorder %s658_s23, 1  ;;  %p158_p7 = scmp.eq.s32.totalorder %s155_s29, 0 }
   0xb   : > { %p742_p8 = por %p177_p5, %p176_p3  ;;  %p218_p9 = scmp.lt.s32.totalorder %s658_s23, 3 }
   0xc   : > { %s748_s6 = scalar_select %p158_p7, %s646_s20, %s160_s27  }
   0xd   : > { %p219_p10 = pnand %p488_p6, %p218_p9 }
   0xe   : > { %p249_p11 = scmp.lt.s32.totalorder (!%p219_p10), %s650_s21, 1  ;;  %v660_v0 = vmov (!%p219_p10), 0.0|0.0   ;;  %vm661_vm0 = vmmov (!%p219_p10), 0   ;;  %v662_v1 = vmov (!%p219_p10), 0.0   ;;  %v262_v2 = vld [vmem:[%s824_s2] sm:$0xff] (!%p219_p10)  ;;  %v663_v3 = vmov (!%p219_p10), 0  }
   0xf   : > { %222 = sbr.rel (%p219_p10) target bundleno = 626 (0x272), region = 40  ;;  %509 = vmatprep.subr.bf16.mxu0 (!%p219_p10), %v660_v0  ;;  %506 = vmatprep.mubr.msk.f32.mxu0 (!%p219_p10), %vm661_vm0, %v662_v1  ;;  %v261_v8 = vld [vmem:[%s823_s1] sm:$0xff] (!%p219_p10)  ;;  %vm268_vm1 = vcmask (!%p219_p10), 195584   ;;  %vm342_vm2 = vcmask (!%p219_p10), 130048   ;;  %s246_s7 = sand.u32 (!%p219_p10), 1, %s642_s19  }
  0x10   : > { %576 = vset.pattern.permute.xlu0 (!%p219_p10), %v663_v3  ;;  %577 = vset.pattern.permute.xlu1 (!%p219_p10), %v663_v3  ;;  %v373_v38 = vld [vmem:[%s825_s3] sm:$0xff] (!%p219_p10)  ;;  %s489_s8 = sshll.u32 (!%p219_p10), %s246_s7, 3  ;;  %s392_s15 = scalar_lea.sflag (!%p219_p10), [#allocation7], %s246_s7 }
  0x11   : > { %265 = vperm.xlu0 (!%p219_p10), %576, %v262_v2   ;;  %v374_v41 = vld [vmem:[%s826_s4] sm:$0xff] (!%p219_p10) }
  0x16   : > { %s250_s9 = scalar_select %p249_p11, %s650_s21, 1 }
  0x18   : > { %s512_s10 = smul.u32 24, %s250_s9  ;;  %s493_s9 = sshll.u32 %s650_s21, 7 }
  0x19   : > { %s774_s14 = scalar_lea.hbm %s827_s5, %s493_s9  ;;  %s664_s21 = smov [#allocation6]  }
  0x1a   : > { %s256_s13 = scalar_lea.vmem %s822_s0, %s512_s10  ;;  %s248_s10 = scalar_lea.vmem [#allocation6], %s489_s8 }
  0x1b   : > { %v258_v4 = vld [vmem:[%s256_s13] sm:$0xff]  ;;  %v259_v5 = vld [vmem:[%s256_s13 + $0x8] sm:$0xff]  ;;  %v260_v7 = vld [vmem:[%s256_s13 + $0x10] sm:$0xff]  ;;  %s407_s11 = sshll.u32 %s248_s10, 4  ;;  %s776_s11 = int_to_ptr.vmem [resolvable:$true] %s407_s11 }
  0x1c   : > { %v510_v6 = vpack.c.bf16 %v259_v5, %v258_v4 }
  0x1e   : > { %511 = vmatpush3.bf16.msra.mxu0 %v510_v6 }
  0x1f   : > { %504 = vmatprep.subr.mxu0 %v662_v1 }
  0x22   : > { %505 = vmatpush3.msra.mxu0 %v260_v7 }
  0x23   : > { %507 = vmatmul.mubr.msk.f32.vlgmr.msra.gmra.mrb[0].mxu0 %vm268_vm1, %v261_v8 }
  0x90   : > { %v266_v9 = vpop.permute.xlu0 %265 }
  0xf6   : > { %v338_v10 = vpop.f32.mrb[0].mxu0 }
  0xf7   : > { %v339_v11 = vadd.f32 %v338_v10, %v266_v9  ;;  %v508_v12 = vpop.f32.mrb[1].mxu0 }
  0xf9   : > { %v343_v13 = vsel %vm342_vm2, %v339_v11, 0.0  ;;  %v354_v14 = vmul.f32 %v339_v11, %v339_v11 }
  0xfa   : > { %344 = vadd.xlane.f32.xlu0 %v343_v13 }
  0xfb   : > { %v355_v15 = vsel %vm342_vm2, %v354_v14, 0.0 }
  0xfc   : > { %356 = vadd.xlane.f32.xlu1 %v355_v15 }
 0x187   : > { %v345_v16 = vpop.xlane.xlu0 %344 }
 0x188   : > { %v346_v17 = vrot.slane %v345_v16, 4 }
 0x189   : > { %v357_v18 = vpop.xlane.xlu1 %356 }
 0x18a   : > { %v347_v19 = vadd.f32 %v346_v17, %v345_v16  ;;  %v358_v20 = vrot.slane %v357_v18, 4 }
 0x18c   : > { %v348_v21 = vrot.slane %v347_v19, 2  ;;  %v359_v22 = vadd.f32 %v358_v20, %v357_v18 }
 0x18e   : > { %v360_v23 = vrot.slane %v359_v22, 2  ;;  %v349_v24 = vadd.f32 %v348_v21, %v347_v19 }
 0x190   : > { %v350_v25 = vrot.slane %v349_v24, 1  ;;  %v361_v26 = vadd.f32 %v360_v23, %v359_v22 }
 0x192   : > { %v351_v27 = vadd.f32 %v350_v25, %v349_v24  ;;  %v362_v28 = vrot.slane %v361_v26, 1 }
 0x194   : > { %513 = vpush %v351_v27  ;;  %v363_v29 = vadd.f32 %v362_v28, %v361_v26 }
 0x196   : > { %515 = vpush %v363_v29 }
 0x1c5   : > { %s514_s16 = spop %513 }
 0x1c6   : > { %v353_v30 = vstv %s514_s16  ;;  %s580_s16 = scalar_lea.vmem %s776_s11, 128 }
 0x1c7   : > { %v366_v31 = vmul.f32 0.0078125, %v353_v30  ;;  %s516_s17 = spop %515  ;;  %p581_p12 = scmp.ne.s32.totalorder %s776_s11, %s580_s16 }
 0x1c8   : > { %v365_v32 = vstv %s516_s17  ;;  %s584_s17 = sshll.u32 %s664_s21, 4  ;;  %s585_s17 = int_to_ptr.vmem [resolvable:$false] %s584_s17 }
 0x1c9   : > { %v368_v33 = vmul.f32 %v366_v31, %v366_v31  ;;  %v367_v34 = vmul.f32 0.0078125, %v365_v32  ;;  %p582_p13 = pnand %p581_p12, %p735_p4  ;;  %s586_s24 = scalar_lea.vmem %s585_s17, 256 }
 0x1ca   : > { %p587_p1 = scmp.lt.s32.totalorder %s776_s11, %s585_s17  ;;  %p588_p2 = scmp.lt.s32.totalorder %s586_s24, %s580_s16 }
 0x1cb   : > { %v369_v35 = vsub.f32 %v367_v34, %v368_v33  ;;  %p583_p0 = pneg %p582_p13 }
 0x1cc   : > { %p589_p3 = por %p588_p2, %p587_p1 }
 0x1cd   : > { %v370_v36 = vmax.f32 %v369_v35, 0.0 }
 0x1ce   : > { %p590_p5 = pnand %p589_p3, %p583_p0 }
 0x1cf   : > { %v371_v37 = vadd.f32 1e-08, %v370_v36 }
 0x1d1   : > { %578 = vrsqrt.f32 %v371_v37 }
 0x1db   : > { %v579_v39 = vpop.eup %578 }
 0x1dc   : > { %v375_v40 = vmul.f32 %v579_v39, %v373_v38 }
 0x1de   : > { %380 = vperm.xlu1 %577, %v375_v40   ;;  %v376_v42 = vmul.f32 %v375_v40, %v366_v31 }
 0x1e0   : > { %v377_v43 = vsub.f32 %v374_v41, %v376_v42 }
 0x1e2   : > { %386 = vperm.xlu1 %577, %v377_v43  }
 0x25d   : > { %v381_v44 = vpop.permute.xlu1 %380 }
 0x25e   : > { %v383_v45 = vmul.f32 %v381_v44, %v339_v11 }
 0x261   : > { %v387_v46 = vpop.permute.xlu1 %386 }
 0x262   : > { %v389_v47 = vadd.f32 %v387_v46, %v383_v45 }
 0x264   : > { %390 = vst.msk [vmem:[%s248_s10] sm:$0xff] %vm342_vm2, %v389_v47 }
 0x265   : > { %593 = shalt.err (!%p590_p5)
}
 0x266   : > { %s594_s25 = scalar_lea.hbm %s774_s14, 128  ;;  %s598_s7 = scalar_lea.hbm %s827_s5, 256 }
 0x267   : > { %p595_p6 = scmp.ne.s32.totalorder %s774_s14, %s594_s25  ;;  %p599_p10 = scmp.lt.u32.totalorder %s774_s14, %s827_s5 }
 0x268   : > { %p600_p11 = scmp.lt.u32.totalorder %s598_s7, %s594_s25  ;;  %p602_p13 = scmp.lt.u32.totalorder %s594_s25, %s774_s14 }
 0x269   : > { %p596_p7 = pnand %p595_p6, %p735_p4 }
 0x26a   : > { %p601_p12 = por %p600_p11, %p599_p10 }
 0x26b   : > { %p597_p9 = pneg %p596_p7 }
 0x26c   : > { %p603_p0 = por %p602_p13, %p601_p12 }
 0x26e   : > { %p604_p1 = pnand %p603_p0, %p597_p9 }
 0x270   : > { %607 = shalt.err (!%p604_p1)
}
 0x271   : > { %517 = dma.vmem_to_hbm [thread:$0]  (%p735_p4), %s776_s11, 128, %s774_s14, %s392_s15  }
 0x272 PF: > { %p523_p2 = scmp.ge.s32.totalorder %s658_s23, 2  ;;  %s419_s10 = sand.u32 1, %s638_s18  }
 0x273   : > { %s420_s12 = scalar_lea.sflag [#allocation7], %s419_s10 }
 0x274   : > { %p520_p3 = pnand %p523_p2, %p742_p8 }
 0x276   : > { %633 = dma.done.wait (!%p520_p3), %s420_s12, 128  }
 0x277   : > { %635 = vsyncadd (!%p520_p3), %s420_s12, 4294967168  ;;  %s18_s23 = sadd.s32 1, %s658_s23   ;;  %s830_s18 = smov %s642_s19 }
 0x278   : > { %p15_p5 = scmp.ge.s32.totalorder %s18_s23, 4   ;;  %s831_s19 = smov %s646_s20 }
 0x279   : > { %s832_s20 = smov %s748_s6  ;;  %s833_s21 = smov %s654_s22 }
 0x27a   : > { %s834_s22 = smov %s836_s26  ;;  %17 = sbr.rel (!%p15_p5) target bundleno = 4 (0x4), region = 75 }
 0x281   :  { %425 = vsyncpa [#allocation7], 1 }
 0x282   :  { %427 = vsyncpa [#allocation7 + $0x1], 1 }

</bundles_post_ra>
